<compile_context>
chip_gen: v7x
topology: tpu7x:2x2x1
jax: 0.10.0
libtpu: 0.0.40
codegen_flags: <defaults>
</compile_context>

<pallas_src>
import functools

import jax
import jax.numpy as jnp
from jax.experimental import pallas as pl
from jax.experimental.pallas import tpu as pltpu


def _editor_attn_kernel(enc_ref, kv_ref, wq_ref, bq_ref, wo_ref, bo_ref,
                        seg_ref, segt_ref, out_ref, attn_scr,
                        *, width, tq, batch_block, bf16_matmul):
    W = width

    # Q projection: one MXU push for every query row of this block.
    enc = enc_ref[...]                                                    # (M, E)
    if bf16_matmul:
        enc = enc.astype(jnp.bfloat16)                                    # wq is already bf16
    q = jnp.dot(enc, wq_ref[...], preferred_element_type=jnp.float32) + bq_ref[...]   # (M, W) f32

    seg = seg_ref[...]      # (W, H) 0/1 channel->head matrix
    segt = segt_ref[...]    # (H, W)
    base = pl.program_id(0) * batch_block

    # Short unrolled loop over the batches of this block (batch_block is small).
    for j in range(batch_block):
        q_b = q[j * tq:(j + 1) * tq, :]                                   # (Tq, W) static slice
        kv_b = kv_ref[pl.ds(base + j, 1), :]                              # (1, 2W) resident table row
        k_b = kv_b[:, :W]                                                 # (1, W)  VPU sublane broadcast
        v_b = kv_b[:, W:]                                                 # (1, W)

        # Per-head dot product: scores[t, h] = <q[t, h, :], k[h, :]>  (f32 always).
        scores = jnp.dot(q_b * k_b, seg, preferred_element_type=jnp.float32)      # (Tq, H)

        # Softmax over the sequence axis, per batch segment (per-segment max: safe).
        m = jnp.max(scores, axis=0, keepdims=True)                        # (1, H)
        e = jnp.exp(scores - m)                                           # (Tq, H)
        denom = jnp.sum(e, axis=0, keepdims=True)                         # (1, H)
        r = pl.reciprocal(denom, approx=True)                             # EUP slot
        r = r * (2.0 - denom * r)                                         # one Newton step -> near-exact
        p = e * r                                                         # (Tq, H)

        # attn[t, c] = p[t, head(c)] * v[c]
        attn_scr[j * tq:(j + 1) * tq, :] = (
            jnp.dot(p, segt, preferred_element_type=jnp.float32) * v_b)   # (Tq, W)

    attn = attn_scr[...]
    if bf16_matmul:
        attn = attn.astype(jnp.bfloat16)                                  # wo is already bf16
    out = jnp.dot(attn, wo_ref[...], preferred_element_type=jnp.float32) + bo_ref[...]
    out_ref[...] = out.astype(out_ref.dtype)


def _vmem_budget_bytes():
    try:
        cap = pltpu.get_tpu_info().vmem_capacity_bytes
    except Exception:
        cap = 64 * 1024 * 1024
    # ~75% of physical: ~48 MiB on v7x (64 MiB/TC), ~96 MiB on v5e/v6e (128 MiB).
    return int(cap * 3 // 4)


def _choose_batch_block(B, Tq, E, W, H, budget):
    """Largest batch_block whose tiles fit the VMEM budget while keeping >=4 grid steps."""
    # Resident (constant-index) operands: wq, bq, wo, bo, seg, segt, kv table (double-buffer pessimism).
    resident = 2 * 4 * (E * W + W + W * E + E + 2 * W * H + 2 * B * W)
    # Per encoder/output row: enc + out tiles double-buffered plus f32 q / attn intermediates.
    per_row = 4 * (4 * E + 2 * W)
    avail = budget - resident
    max_rows = max(Tq, avail // per_row) if avail > 0 else Tq
    max_bb = max(1, min(B, max_rows // Tq, 8))          # cap the unrolled per-batch loop depth

    def tiling_ok(d):
        return (B // d == 1) or ((d * Tq) % 8 == 0)     # sublane tiling constraint on (M, E) blocks

    divisors = [d for d in range(1, B + 1) if B % d == 0 and d <= max_bb and tiling_ok(d)]
    if not divisors:
        return B                                        # single full-array block always legal
    target_steps = min(4, B)                            # keep the pipeline (and both TCs) busy
    good = [d for d in divisors if B // d >= target_steps]
    return max(good) if good else max(divisors)


def editor_attention(editor_hidden_states, encoder_hidden_states, params, *,
                     num_heads, batch_block=None, bf16_matmul=False):
    """editor_hidden_states: (B, Te, E); encoder_hidden_states: (B, Tq, E)."""
    B, Tq, E = encoder_hidden_states.shape
    W = params["wq"].shape[1]
    assert W % num_heads == 0
    head_dim = W // num_heads

    budget = _vmem_budget_bytes()
    if batch_block is None:
        batch_block = _choose_batch_block(B, Tq, E, W, num_heads, budget)
    assert B % batch_block == 0, "batch_block must divide B"
    n_blocks = B // batch_block
    M = batch_block * Tq
    assert n_blocks == 1 or M % 8 == 0, "batch_block*Tq must be a multiple of 8 when tiled"
    # TODO(synk): add an "arbitrary" Tq grid axis (flash-style running max/denominator) for
    # configs where even a single batch's Tq rows exceed the VMEM budget (very long Tq on v7x).

    # ---- glue / loop-invariant work hoisted out of the kernel -----------------------
    enc_flat = encoder_hidden_states.reshape(B * Tq, E)            # batch folded into MXU M rows
    edit_last = editor_hidden_states[:, -1, :]                     # (B, E)
    # Tiny K/V projection once in plain XLA (was recomputed every grid step in v2).
    kv = jnp.concatenate(
        [edit_last @ params["wk"] + params["bk"],
         edit_last @ params["wv"] + params["bv"]], axis=1).astype(jnp.float32)     # (B, 2W)

    chan = jnp.arange(W)
    head = jnp.arange(num_heads)
    seg = (chan[:, None] // head_dim == head[None, :]).astype(jnp.float32)          # (W, H)
    segt = seg.T                                                                    # (H, W)

    wq, wo = params["wq"], params["wo"]
    if bf16_matmul:
        wq = wq.astype(jnp.bfloat16)   # halves the resident weight footprint too
        wo = wo.astype(jnp.bfloat16)

    kernel = functools.partial(_editor_attn_kernel, width=W, tq=Tq,
                               batch_block=batch_block, bf16_matmul=bf16_matmul)
    const2d = lambda shape: pl.BlockSpec(shape, lambda b: (0, 0))

    grid_spec = pltpu.PrefetchScalarGridSpec(
        num_scalar_prefetch=0,
        grid=(n_blocks,),
        in_specs=[
            pl.BlockSpec((M, E), lambda b: (b, 0)),    # encoder rows of this block
            const2d((B, 2 * W)),                       # precomputed K|V rows (tiny, resident)
            const2d((E, W)), const2d((1, W)),          # wq, bq
            const2d((W, E)), const2d((1, E)),          # wo, bo
            const2d((W, num_heads)),                   # seg  (channel -> head)
            const2d((num_heads, W)),                   # segt (head -> channel)
        ],
        out_specs=pl.BlockSpec((M, E), lambda b: (b, 0)),
        scratch_shapes=[pltpu.VMEM((M, W), jnp.float32)],
    )

    fn = pl.pallas_call(
        kernel,
        out_shape=jax.ShapeDtypeStruct((B * Tq, E), jnp.float32),
        grid_spec=grid_spec,
        compiler_params=pltpu.CompilerParams(
            dimension_semantics=("parallel",),
            vmem_limit_bytes=budget,
        ),
    )
    out_flat = fn(enc_flat, kv, wq, params["bq"], wo, params["bo"], seg, segt)
    # Matches torch forward's (attn_output, None) when output_attentions=False.
    return out_flat.reshape(B, Tq, E), None


def _reference(editor_hidden_states, encoder_hidden_states, params, *, num_heads):
    """Pure-JAX replica of the torch forward, for verification."""
    B, Tq, E = encoder_hidden_states.shape
    W = params["wq"].shape[1]
    D = W // num_heads
    q = encoder_hidden_states @ params["wq"] + params["bq"][0]          # (B, Tq, W)
    edit_last = editor_hidden_states[:, -1, :]
    k = edit_last @ params["wk"] + params["bk"][0]                      # (B, W)
    v = edit_last @ params["wv"] + params["bv"][0]                      # (B, W)
    sq = q.reshape(B, Tq, num_heads, D)
    sk = k.reshape(B, num_heads, D)
    sv = v.reshape(B, num_heads, D)
    kq = jnp.einsum("bthd,bhd->bht", sq, sk)                            # (B, H, Tq)
    p = jax.nn.softmax(kq, axis=-1)
    attn = jnp.einsum("bht,bhd->bthd", p, sv).reshape(B, Tq, W)
    return attn @ params["wo"] + params["bo"][0]


if __name__ == "__main__":
    # Config: n_embd=32, edit_channel_multiply_factor=2 -> W=64, num_editing_heads=8 -> head_dim=8
    B, Tq, Te, E = 2, 8, 5, 32
    num_heads, mult = 8, 2
    W = E * mult

    key = jax.random.PRNGKey(0)
    keys = jax.random.split(key, 12)
    scale = 0.05
    params = {
        "wq": scale * jax.random.normal(keys[0], (E, W), jnp.float32),
        "bq": scale * jax.random.normal(keys[1], (1, W), jnp.float32),
        "wk": scale * jax.random.normal(keys[2], (E, W), jnp.float32),
        "bk": scale * jax.random.normal(keys[3], (1, W), jnp.float32),
        "wv": scale * jax.random.normal(keys[4], (E, W), jnp.float32),
        "bv": scale * jax.random.normal(keys[5], (1, W), jnp.float32),
        "wo": scale * jax.random.normal(keys[6], (W, E), jnp.float32),
        "bo": scale * jax.random.normal(keys[7], (1, E), jnp.float32),
    }
    editor_hidden_states = jax.random.normal(keys[8], (B, Te, E), jnp.float32)
    encoder_hidden_states = jax.random.normal(keys[9], (B, Tq, E), jnp.float32)

    ref = _reference(editor_hidden_states, encoder_hidden_states, params,
                     num_heads=num_heads)

    # f32 matmul path (numerics match the torch module).
    out, _ = editor_attention(editor_hidden_states, encoder_hidden_states, params,
                              num_heads=num_heads)
    out = jax.block_until_ready(out)
    assert out.shape == (B, Tq, E)
    assert jnp.allclose(out, ref, atol=2e-4, rtol=5e-3), "f32 path mismatch vs reference"

    # Optional bf16-operand matmuls (f32 accumulation, f32 softmax path) — perf mode.
    out_bf16, _ = editor_attention(editor_hidden_states, encoder_hidden_states, params,
                                   num_heads=num_heads, bf16_matmul=True)
    out_bf16 = jax.block_until_ready(out_bf16)
    assert bool(jnp.all(jnp.isfinite(out_bf16)))
    assert jnp.allclose(out_bf16, ref, atol=1e-2, rtol=5e-2), "bf16 path mismatch vs reference"

    print("KERNEL_OK")
</pallas_src>

<mosaic_0001>
module attributes {stable_mosaic.version = 11 : i64} {
  func.func @_editor_attn_kernel(%arg0: i32, %arg1: memref<8x32xf32, #tpu.memory_space<vmem>>, %arg2: memref<2x128xf32, #tpu.memory_space<vmem>>, %arg3: memref<32x64xf32, #tpu.memory_space<vmem>>, %arg4: memref<1x64xf32, #tpu.memory_space<vmem>>, %arg5: memref<64x32xf32, #tpu.memory_space<vmem>>, %arg6: memref<1x32xf32, #tpu.memory_space<vmem>>, %arg7: memref<64x8xf32, #tpu.memory_space<vmem>>, %arg8: memref<8x64xf32, #tpu.memory_space<vmem>>, %arg9: memref<8x32xf32, #tpu.memory_space<vmem>>, %arg10: memref<8x64xf32, #tpu.memory_space<vmem>>) attributes {dimension_semantics = [#tpu.dimension_semantics<parallel>], iteration_bounds = array<i64: 2>, scalar_prefetch = 0 : i64, scratch_operands = 1 : i64, tpu.core_type = #tpu.core_type<tc>, window_params = [{transform_indices = @transform_0, window_bounds = array<i64: 8, 32>}, {pipeline_mode = #tpu.pipeline_mode<synchronous>, transform_indices = @transform_1, window_bounds = array<i64: 2, 128>}, {pipeline_mode = #tpu.pipeline_mode<synchronous>, transform_indices = @transform_2, window_bounds = array<i64: 32, 64>}, {pipeline_mode = #tpu.pipeline_mode<synchronous>, transform_indices = @transform_3, window_bounds = array<i64: 1, 64>}, {pipeline_mode = #tpu.pipeline_mode<synchronous>, transform_indices = @transform_4, window_bounds = array<i64: 64, 32>}, {pipeline_mode = #tpu.pipeline_mode<synchronous>, transform_indices = @transform_5, window_bounds = array<i64: 1, 32>}, {pipeline_mode = #tpu.pipeline_mode<synchronous>, transform_indices = @transform_6, window_bounds = array<i64: 64, 8>}, {pipeline_mode = #tpu.pipeline_mode<synchronous>, transform_indices = @transform_7, window_bounds = array<i64: 8, 64>}, {transform_indices = @transform_8, window_bounds = array<i64: 8, 32>}]} {
    %c0 = arith.constant 0 : index
    %c0_0 = arith.constant 0 : index
    %0 = vector.load %arg1[%c0, %c0_0] : memref<8x32xf32, #tpu.memory_space<vmem>>, vector<8x32xf32>
    %c0_1 = arith.constant 0 : index
    %c0_2 = arith.constant 0 : index
    %1 = vector.load %arg3[%c0_1, %c0_2] : memref<32x64xf32, #tpu.memory_space<vmem>>, vector<32x64xf32>
    %cst = arith.constant dense<0.000000e+00> : vector<8x64xf32>
    %2 = tpu.matmul %0, %1, %cst {dimension_numbers = #tpu.dot_dimension_numbers<[1], [0], [0], [1], [0, 0, 1, 1], [], []>} : vector<8x32xf32>, vector<32x64xf32>, vector<8x64xf32> -> vector<8x64xf32>
    %c0_3 = arith.constant 0 : index
    %c0_4 = arith.constant 0 : index
    %3 = vector.load %arg4[%c0_3, %c0_4] : memref<1x64xf32, #tpu.memory_space<vmem>>, vector<1x64xf32>
    %4 = vector.broadcast %3 : vector<1x64xf32> to vector<8x64xf32>
    %5 = arith.addf %2, %4 : vector<8x64xf32>
    %c0_5 = arith.constant 0 : index
    %c0_6 = arith.constant 0 : index
    %6 = vector.load %arg7[%c0_5, %c0_6] : memref<64x8xf32, #tpu.memory_space<vmem>>, vector<64x8xf32>
    %c0_7 = arith.constant 0 : index
    %c0_8 = arith.constant 0 : index
    %7 = vector.load %arg8[%c0_7, %c0_8] : memref<8x64xf32, #tpu.memory_space<vmem>>, vector<8x64xf32>
    %c1_i32 = arith.constant 1 : i32
    %8 = arith.muli %arg0, %c1_i32 : i32
    %c0_i32 = arith.constant 0 : i32
    %9 = arith.addi %8, %c0_i32 : i32
    %10 = arith.index_cast %9 : i32 to index
    %c0_9 = arith.constant 0 : index
    %11 = vector.load %arg2[%10, %c0_9] : memref<2x128xf32, #tpu.memory_space<vmem>>, vector<1x128xf32>
    %12 = vector.extract_strided_slice %11 {offsets = [0, 0], sizes = [1, 64], strides = [1, 1]} : vector<1x128xf32> to vector<1x64xf32>
    %13 = vector.extract_strided_slice %11 {offsets = [0, 64], sizes = [1, 64], strides = [1, 1]} : vector<1x128xf32> to vector<1x64xf32>
    %14 = vector.broadcast %12 : vector<1x64xf32> to vector<8x64xf32>
    %15 = arith.mulf %5, %14 : vector<8x64xf32>
    %cst_10 = arith.constant dense<0.000000e+00> : vector<8x8xf32>
    %16 = tpu.matmul %15, %6, %cst_10 {dimension_numbers = #tpu.dot_dimension_numbers<[1], [0], [0], [1], [0, 0, 1, 1], [], []>} : vector<8x64xf32>, vector<64x8xf32>, vector<8x8xf32> -> vector<8x8xf32>
    %cst_11 = arith.constant dense<0xFF800000> : vector<8xf32>
    %17 = vector.multi_reduction <maximumf>, %16, %cst_11 [0] : vector<8x8xf32> to vector<8xf32>
    %18 = vector.shape_cast %17 : vector<8xf32> to vector<1x8xf32>
    %19 = vector.broadcast %18 : vector<1x8xf32> to vector<8x8xf32>
    %20 = arith.subf %16, %19 : vector<8x8xf32>
    %21 = math.exp %20 : vector<8x8xf32>
    %cst_12 = arith.constant dense<0.000000e+00> : vector<8xf32>
    %22 = vector.multi_reduction <add>, %21, %cst_12 [0] : vector<8x8xf32> to vector<8xf32>
    %23 = vector.shape_cast %22 : vector<8xf32> to vector<1x8xf32>
    %24 = tpu.reciprocal %23 {approx = true} : vector<1x8xf32> -> vector<1x8xf32>
    %25 = arith.mulf %23, %24 : vector<1x8xf32>
    %cst_13 = arith.constant 2.000000e+00 : f32
    %26 = vector.broadcast %cst_13 : f32 to vector<1x8xf32>
    %27 = arith.subf %26, %25 : vector<1x8xf32>
    %28 = arith.mulf %24, %27 : vector<1x8xf32>
    %29 = vector.broadcast %28 : vector<1x8xf32> to vector<8x8xf32>
    %30 = arith.mulf %21, %29 : vector<8x8xf32>
    %cst_14 = arith.constant dense<0.000000e+00> : vector<8x64xf32>
    %31 = tpu.matmul %30, %7, %cst_14 {dimension_numbers = #tpu.dot_dimension_numbers<[1], [0], [0], [1], [0, 0, 1, 1], [], []>} : vector<8x8xf32>, vector<8x64xf32>, vector<8x64xf32> -> vector<8x64xf32>
    %32 = vector.broadcast %13 : vector<1x64xf32> to vector<8x64xf32>
    %33 = arith.mulf %31, %32 : vector<8x64xf32>
    %c0_15 = arith.constant 0 : index
    %c0_16 = arith.constant 0 : index
    %34 = vector.load %arg10[%c0_15, %c0_16] : memref<8x64xf32, #tpu.memory_space<vmem>>, vector<8x64xf32>
    tpu.vector_store %arg10[%c0_15, %c0_16], %33 {strides = array<i32>} : memref<8x64xf32, #tpu.memory_space<vmem>>, vector<8x64xf32>,
    %c0_17 = arith.constant 0 : index
    %c0_18 = arith.constant 0 : index
    %35 = vector.load %arg10[%c0_17, %c0_18] : memref<8x64xf32, #tpu.memory_space<vmem>>, vector<8x64xf32>
    %c0_19 = arith.constant 0 : index
    %c0_20 = arith.constant 0 : index
    %36 = vector.load %arg5[%c0_19, %c0_20] : memref<64x32xf32, #tpu.memory_space<vmem>>, vector<64x32xf32>
    %cst_21 = arith.constant dense<0.000000e+00> : vector<8x32xf32>
    %37 = tpu.matmul %35, %36, %cst_21 {dimension_numbers = #tpu.dot_dimension_numbers<[1], [0], [0], [1], [0, 0, 1, 1], [], []>} : vector<8x64xf32>, vector<64x32xf32>, vector<8x32xf32> -> vector<8x32xf32>
    %c0_22 = arith.constant 0 : index
    %c0_23 = arith.constant 0 : index
    %38 = vector.load %arg6[%c0_22, %c0_23] : memref<1x32xf32, #tpu.memory_space<vmem>>, vector<1x32xf32>
    %39 = vector.broadcast %38 : vector<1x32xf32> to vector<8x32xf32>
    %40 = arith.addf %37, %39 : vector<8x32xf32>
    %c0_24 = arith.constant 0 : index
    %c0_25 = arith.constant 0 : index
    %41 = vector.load %arg9[%c0_24, %c0_25] : memref<8x32xf32, #tpu.memory_space<vmem>>, vector<8x32xf32>
    tpu.vector_store %arg9[%c0_24, %c0_25], %40 {strides = array<i32>} : memref<8x32xf32, #tpu.memory_space<vmem>>, vector<8x32xf32>,
    return
  }
  func.func @transform_0(%arg0: i32) -> (i32, i32) {
    %c0_i32 = arith.constant 0 : i32
    %c0_i32_0 = arith.constant 0 : i32
    return %arg0, %c0_i32 : i32, i32
  }
  func.func @transform_1(%arg0: i32) -> (i32, i32) {
    %c0_i32 = arith.constant 0 : i32
    %c0_i32_0 = arith.constant 0 : i32
    %c0_i32_1 = arith.constant 0 : i32
    return %c0_i32, %c0_i32_0 : i32, i32
  }
  func.func @transform_2(%arg0: i32) -> (i32, i32) {
    %c0_i32 = arith.constant 0 : i32
    %c0_i32_0 = arith.constant 0 : i32
    %c0_i32_1 = arith.constant 0 : i32
    return %c0_i32, %c0_i32_0 : i32, i32
  }
  func.func @transform_3(%arg0: i32) -> (i32, i32) {
    %c0_i32 = arith.constant 0 : i32
    %c0_i32_0 = arith.constant 0 : i32
    %c0_i32_1 = arith.constant 0 : i32
    return %c0_i32, %c0_i32_0 : i32, i32
  }
  func.func @transform_4(%arg0: i32) -> (i32, i32) {
    %c0_i32 = arith.constant 0 : i32
    %c0_i32_0 = arith.constant 0 : i32
    %c0_i32_1 = arith.constant 0 : i32
    return %c0_i32, %c0_i32_0 : i32, i32
  }
  func.func @transform_5(%arg0: i32) -> (i32, i32) {
    %c0_i32 = arith.constant 0 : i32
    %c0_i32_0 = arith.constant 0 : i32
    %c0_i32_1 = arith.constant 0 : i32
    return %c0_i32, %c0_i32_0 : i32, i32
  }
  func.func @transform_6(%arg0: i32) -> (i32, i32) {
    %c0_i32 = arith.constant 0 : i32
    %c0_i32_0 = arith.constant 0 : i32
    %c0_i32_1 = arith.constant 0 : i32
    return %c0_i32, %c0_i32_0 : i32, i32
  }
  func.func @transform_7(%arg0: i32) -> (i32, i32) {
    %c0_i32 = arith.constant 0 : i32
    %c0_i32_0 = arith.constant 0 : i32
    %c0_i32_1 = arith.constant 0 : i32
    return %c0_i32, %c0_i32_0 : i32, i32
  }
  func.func @transform_8(%arg0: i32) -> (i32, i32) {
    %c0_i32 = arith.constant 0 : i32
    %c0_i32_0 = arith.constant 0 : i32
    return %arg0, %c0_i32 : i32, i32
  }
}

</mosaic_0001>

<bundles_post_ra>
// kernel: tpu_custom_call.1
= control target key start
LH: loop header
LB: loop body
LE: loop exit
PB: predicated region body
PF: predicated region fallthrough
CT: control target
= control target key end

     0   :  { %13 = vsyncpa [#allocation4], 0  ;;  %s1230_s0 = inlined_call_operand.vmem [shape: f32[16,32], index: 0, kind: input, shape index: {}]   ;;  %s1231_s1 = inlined_call_operand.vmem [shape: f32[2,128], index: 1, kind: input, shape index: {}]   ;;  %s1232_s2 = inlined_call_operand.vmem [shape: f32[32,64], index: 2, kind: input, shape index: {}]   ;;  %s1233_s3 = inlined_call_operand.vmem [shape: f32[1,64], index: 3, kind: input, shape index: {}]   ;;  %s1234_s4 = inlined_call_operand.vmem [shape: f32[64,32], index: 4, kind: input, shape index: {}]   ;;  %s1235_s5 = inlined_call_operand.vmem [shape: f32[1,32], index: 5, kind: input, shape index: {}]   ;;  %s1236_s6 = inlined_call_operand.vmem [shape: f32[64,8], index: 6, kind: input, shape index: {}]   ;;  %s1237_s7 = inlined_call_operand.vmem [shape: f32[8,64], index: 7, kind: input, shape index: {}]   ;;  %s1238_s8 = inlined_call_operand.hbm [shape: f32[16,32], index: 8, kind: output, shape index: {}]  }
   0x1   :  { %15 = vsyncpa [#allocation4 + $0x1], 0  ;;  %s1030_s27 = smov 0   ;;  %s1032_s28 = smov 0  }
   0x2   :  { %s1034_s29 = smov 0   ;;  %s1036_s30 = smov 0  }
   0x3 LB: > { %s1051_s9 = sadd.s32 4294967295, %s978_s30   ;;  %s743_s10 = sadd.s32 4294967294, %s978_s30   ;;  %s978_s30 = sphi %s1036_s30, %s1244_s30   ;;  %s974_s29 = sphi %s1034_s29, %s1243_s29   ;;  %s970_s28 = sphi %s1032_s28, %s1242_s28   ;;  %s966_s27 = sphi %s1030_s27, %s1241_s27  }
   0x4   : > { %s1055_s11 = sadd.s32 1, %s978_s30   ;;  %s201_s12 = sadd.s32 1, %s974_s29 }
   0x5   : > { %s198_s13 = ssub.s32 %s978_s30, %s1055_s11  ;;  %p211_p0 = scmp.ne.s32.totalorder %s974_s29, %s970_s28 }
   0x6   : > { %p199_p1 = scmp.eq.s32.totalorder %s198_s13, 0  ;;  %p212_p2 = scmp.eq.s32.totalorder %s1051_s9, 1 }
   0x7   : > { %p217_p3 = scmp.ne.s32.totalorder %s970_s28, %s966_s27  ;;  %p218_p4 = scmp.eq.s32.totalorder %s743_s10, 1 }
   0x8   : > { %s1066_s14 = scalar_select %p199_p1, %s974_s29, %s201_s12  }
   0x9   : > { %p1068_p5 = por %p212_p2, %p211_p0  ;;  %p1072_p6 = por %p218_p4, %p217_p3 }
   0xa   : > { %p746_p7 = scmp.ge.s32.totalorder %s978_s30, 1  ;;  %p264_p8 = scmp.lt.s32.totalorder %s978_s30, 3 }
   0xc   : > { %p265_p9 = pnand %p746_p7, %p264_p8 }
   0xd   : > { %v302_v0 = vld [vmem:[%s1232_s2] sm:$0xff] (!%p265_p9)  ;;  %v303_v1 = vld [vmem:[%s1232_s2 + $0x8] sm:$0xff] (!%p265_p9)  ;;  %v304_v2 = vld [vmem:[%s1232_s2 + $0x10] sm:$0xff] (!%p265_p9)  ;;  %v980_v3 = vmov (!%p265_p9), 0.0|0.0   ;;  %vm981_vm0 = vmmov (!%p265_p9), 0   ;;  %v982_v6 = vmov (!%p265_p9), 0.0   ;;  %s396_s22 = scalar_lea.vmem (!%p265_p9), %s1231_s1, %s1051_s9 }
   0xe   : > { %268 = sbr.rel (%p265_p9) target bundleno = 964 (0x3c4), region = 52  ;;  %839 = vmatprep.subr.bf16.mxu1 (!%p265_p9), %v980_v3  ;;  %v840_v4 = vpack.c.bf16 (!%p265_p9), %v303_v1, %v302_v0  ;;  %v305_v5 = vld [vmem:[%s1232_s2 + $0x18] sm:$0xff] (!%p265_p9)  ;;  %793 = vmatprep.mubr.msk.f32.mxu1 (!%p265_p9), %vm981_vm0, %v982_v6  ;;  %p297_p10 = scmp.lt.s32.totalorder (!%p265_p9), %s1051_s9, 1  ;;  %v387_v8 = vld [vmem:[%s1236_s6] sm:$0xff] (!%p265_p9)  ;;  %v388_v9 = vld [vmem:[%s1236_s6 + $0x8] sm:$0xff] (!%p265_p9)  ;;  %vm313_vm1 = vcmask (!%p265_p9), 261120  }
   0xf   : > { %815 = vmatprep.subr.mxu0 (!%p265_p9), %v982_v6  ;;  %817 = vmatprep.mubr.msk.f32.mxu0 (!%p265_p9), %vm981_vm0, %v982_v6  ;;  %v843_v7 = vpack.c.bf16 (!%p265_p9), %v305_v5, %v304_v2  ;;  %v846_v11 = vpack.c.bf16 (!%p265_p9), %v388_v9, %v387_v8  ;;  %v389_v12 = vld [vmem:[%s1236_s6 + $0x10] sm:$0xff] (!%p265_p9)  ;;  %v390_v13 = vld [vmem:[%s1236_s6 + $0x18] sm:$0xff] (!%p265_p9)  ;;  %v391_v15 = vld [vmem:[%s1236_s6 + $0x20] sm:$0xff] (!%p265_p9)  ;;  %vm403_vm2 = vcmask (!%p265_p9), 523264   ;;  %s983_s10 = smov (!%p265_p9), 64   ;;  %vm477_vm3 = vcmask (!%p265_p9), 64512  }
  0x10   : > { %841 = vmatpush3.bf16.msra.mxu1 (!%p265_p9), %v840_v4  ;;  %v849_v14 = vpack.c.bf16 (!%p265_p9), %v390_v13, %v389_v12  ;;  %v392_v16 = vld [vmem:[%s1236_s6 + $0x28] sm:$0xff] (!%p265_p9)  ;;  %v393_v18 = vld [vmem:[%s1236_s6 + $0x30] sm:$0xff] (!%p265_p9)  ;;  %v394_v19 = vld [vmem:[%s1236_s6 + $0x38] sm:$0xff] (!%p265_p9)  ;;  %s294_s18 = sand.u32 (!%p265_p9), 1, %s970_s28  }
  0x11   : > { %842 = vmatprep.subr.bf16.mxu1 (!%p265_p9), %v980_v3  ;;  %v852_v17 = vpack.c.bf16 (!%p265_p9), %v392_v16, %v391_v15  ;;  %v855_v20 = vpack.c.bf16 (!%p265_p9), %v394_v19, %v393_v18  ;;  %v749_v21 = vld [vmem:[%s1233_s3] ss:$0 sm:$0xff] (!%p265_p9)  ;;  %v581_v51 = vld [vmem:[%s1234_s4 + $0x8] sm:$0xff] (!%p265_p9)  ;;  %v582_v55 = vld [vmem:[%s1234_s4 + $0x10] sm:$0xff] (!%p265_p9)  ;;  %s747_s19 = sshll.u32 (!%p265_p9), %s294_s18, 3  ;;  %s670_s12 = scalar_lea.sflag (!%p265_p9), [#allocation4], %s294_s18 }
  0x12   : > { %v751_v23 = vld [vmem:[%s396_s22] ss:$0 sm:$0xff] (!%p265_p9)  ;;  %v583_v56 = vld [vmem:[%s1234_s4 + $0x18] sm:$0xff] (!%p265_p9)  ;;  %v585_v59 = vld [vmem:[%s1234_s4 + $0x28] sm:$0xff] (!%p265_p9)  ;;  %s757_s22 = sshll.u32 (!%p265_p9), %s1051_s9, 7  ;;  %s296_s23 = scalar_lea.vmem (!%p265_p9), [#allocation3], %s747_s19 }
  0x13   : > { %v395_v27 = vld [vmem:[%s1237_s7] sm:$0xff] (!%p265_p9)  ;;  %574 = vrot.lane.b32.xlu0 (!%p265_p9), %v751_v23, %s983_s10  ;;  %v861_v57 = vpack.c.bf16 (!%p265_p9), %v583_v56, %v582_v55  ;;  %v586_v61 = vld [vmem:[%s1234_s4 + $0x30] sm:$0xff] (!%p265_p9)  ;;  %v587_v62 = vld [vmem:[%s1234_s4 + $0x38] sm:$0xff] (!%p265_p9)  ;;  %s683_s24 = sshll.u32 (!%p265_p9), %s296_s23, 4  ;;  %s1187_s10 = scalar_lea.hbm (!%p265_p9), %s1238_s8, %s757_s22  ;;  %s1189_s24 = int_to_ptr.vmem [resolvable:$true] %s683_s24 }
  0x14   : > { %844 = vmatpush3.bf16.msra.mxu1 (!%p265_p9), %v843_v7  ;;  %816 = vmatpush3.msra.mxu0 (!%p265_p9), %v395_v27  ;;  %v580_v50 = vld [vmem:[%s1234_s4] sm:$0xff] (!%p265_p9)  ;;  %v867_v63 = vpack.c.bf16 (!%p265_p9), %v587_v62, %v586_v61  ;;  %s916_s13 = scalar_lea.vmem (!%p265_p9), %s1189_s24, 128 }
  0x15   : > { %s298_s25 = scalar_select %p297_p10, %s1051_s9, 1  ;;  %845 = vmatprep.subr.bf16.mxu1 %v980_v3  ;;  %857 = vmatprep.subr.bf16.mxu0 %v980_v3  ;;  %v858_v53 = vpack.c.bf16 %v581_v51, %v580_v50  ;;  %v584_v58 = vld [vmem:[%s1234_s4 + $0x20] sm:$0xff] }
  0x16   : > { %v864_v60 = vpack.c.bf16 %v585_v59, %v584_v58  ;;  %p917_p11 = scmp.ne.s32.totalorder %s1189_s24, %s916_s13  ;;  %s984_s9 = smov [#allocation3]  }
  0x17   : > { %s748_s17 = sshll.u32 %s298_s25, 3 }
  0x18   : > { %s300_s20 = scalar_lea.vmem %s1230_s0, %s748_s17  ;;  %p918_p12 = pnand %p917_p11, %p1068_p5 }
  0x19   : > { %v301_v10 = vld [vmem:[%s300_s20] sm:$0xff]  ;;  %s920_s17 = sshll.u32 %s984_s9, 4  ;;  %s921_s17 = int_to_ptr.vmem [resolvable:$false] %s920_s17 }
  0x1a   : > { %794 = vmatmul.mubr.msk.f32.vlgmr.msra.gmra.mrb[0].mxu1 %vm313_vm1, %v301_v10  ;;  %p919_p13 = pneg %p918_p12  ;;  %s922_s19 = scalar_lea.vmem %s921_s17, 256 }
  0x1b   : > { %847 = vmatpush3.bf16.msra.mxu1 %v846_v11  ;;  %812 = vmatprep.mubr.msk.f32.mxu1 %vm981_vm0, %v982_v6  ;;  %p923_p0 = scmp.lt.s32.totalorder %s1189_s24, %s921_s17  ;;  %p924_p1 = scmp.lt.s32.totalorder %s922_s19, %s916_s13 }
  0x1c   : > { %848 = vmatprep.subr.bf16.mxu1 %v980_v3 }
  0x1d   : > { %p925_p2 = por %p924_p1, %p923_p0 }
  0x1f   : > { %850 = vmatpush3.bf16.msra.mxu1 %v849_v14  ;;  %p926_p3 = pnand %p925_p2, %p919_p13 }
  0x20   : > { %851 = vmatprep.subr.bf16.mxu1 %v980_v3 }
  0x23   : > { %853 = vmatpush3.bf16.msra.mxu1 %v852_v17 }
  0x24   : > { %854 = vmatprep.subr.bf16.mxu1 %v980_v3 }
  0x27   : > { %856 = vmatpush3.bf16.msra.mxu1 %v855_v20 }
  0x85   : > { %v575_v0 = vpop.permute.xlu0 %574 }
  0xed   : > { %v383_v22 = vpop.f32.mrb[0].mxu1 }
  0xee   : > { %v384_v24 = vadd.f32 %v749_v21, %v383_v22  ;;  %v795_v25 = vpop.f32.mrb[1].mxu1 }
  0xf0   : > { %v402_v26 = vmul.f32 %v751_v23, %v384_v24 }
  0xf2   : > { %813 = vmatmul.mubr.msk.f32.vlgmr.msra.gmra.mrb[2].mxu1 %vm403_vm2, %v402_v26 }
 0x1c5   : > { %v473_v28 = vpop.f32.mrb[2].mxu1 }
 0x1c6   : > { %v478_v29 = vsel %vm477_vm3, %v473_v28, -inf  ;;  %v814_v30 = vpop.f32.mrb[3].mxu1 }
 0x1c7   : > { %v479_v31 = vrot.slane %v478_v29, 4 }
 0x1c9   : > { %v480_v32 = vmax.f32 %v478_v29, %v479_v31 }
 0x1cb   : > { %v481_v33 = vrot.slane %v480_v32, 2 }
 0x1cd   : > { %v482_v34 = vmax.f32 %v480_v32, %v481_v33 }
 0x1cf   : > { %v483_v35 = vrot.slane %v482_v34, 1 }
 0x1d1   : > { %v484_v36 = vmax.f32 %v482_v34, %v483_v35 }
 0x1d3   : > { %v485_v37 = vsub.f32 %v473_v28, %v484_v36 }
 0x1d5   : > { %v486_v38 = vmul.f32 1.442695, %v485_v37 }
 0x1d7   : > { %912 = vpow2.f32 %v486_v38 }
 0x1e1   : > { %v913_v39 = vpop.eup %912 }
 0x1e2   : > { %v488_v40 = vsel %vm477_vm3, %v913_v39, 0.0 }
 0x1e3   : > { %v489_v41 = vrot.slane %v488_v40, 4 }
 0x1e5   : > { %v490_v42 = vadd.f32 %v489_v41, %v488_v40 }
 0x1e7   : > { %v491_v43 = vrot.slane %v490_v42, 2 }
 0x1e9   : > { %v492_v44 = vadd.f32 %v491_v43, %v490_v42 }
 0x1eb   : > { %v493_v45 = vrot.slane %v492_v44, 1 }
 0x1ed   : > { %v494_v46 = vadd.f32 %v493_v45, %v492_v44 }
 0x1ef   : > { %914 = vrcp.f32 %v494_v46 }
 0x1f9   : > { %v915_v47 = vpop.eup %914 }
 0x1fa   : > { %v496_v48 = vmul.f32 %v915_v47, %v494_v46 }
 0x1fc   : > { %v497_v49 = vsub.f32 2.0, %v496_v48 }
 0x1fe   : > { %v498_v52 = vmul.f32 %v915_v47, %v497_v49 }
 0x200   : > { %v499_v54 = vmul.f32 %v913_v39, %v498_v52 }
 0x202   : > { %818 = vmatmul.mubr.msk.f32.vlgmr.msra.gmra.mrb[0].mxu0 %vm477_vm3, %v499_v54 }
 0x203   : > { %859 = vmatpush3.bf16.msra.mxu0 %v858_v53  ;;  %836 = vmatprep.mubr.msk.f32.mxu0 %vm981_vm0, %v982_v6  ;;  %v754_v6 = vld [vmem:[%s1235_s5] ss:$0 sm:$0xff] }
 0x204   : > { %860 = vmatprep.subr.bf16.mxu0 %v980_v3 }
 0x207   : > { %862 = vmatpush3.bf16.msra.mxu0 %v861_v57 }
 0x208   : > { %863 = vmatprep.subr.bf16.mxu0 %v980_v3 }
 0x20b   : > { %865 = vmatpush3.bf16.msra.mxu0 %v864_v60 }
 0x20c   : > { %866 = vmatprep.subr.bf16.mxu0 %v980_v3 }
 0x20f   : > { %868 = vmatpush3.bf16.msra.mxu0 %v867_v63 }
 0x2d5   : > { %v569_v1 = vpop.f32.mrb[0].mxu0 }
 0x2d6   : > { %v577_v2 = vmul.f32 %v575_v0, %v569_v1  ;;  %v819_v4 = vpop.f32.mrb[1].mxu0 }
 0x2d8   : > { %578 = vst.msk [vmem:[#allocation2] sm:$0xff] %vm403_vm2, %v577_v2 }
 0x2df   : > { %v579_v5 = vld [vmem:[#allocation2] sm:$0xff] }
 0x2e0   : > { %837 = vmatmul.mubr.msk.f32.vlgmr.msra.gmra.mrb[2].mxu0 %vm403_vm2, %v579_v5 }
 0x3b3   : > { %v664_v3 = vpop.f32.mrb[2].mxu0 }
 0x3b4   : > { %v665_v7 = vadd.f32 %v754_v6, %v664_v3  ;;  %v838_v8 = vpop.f32.mrb[3].mxu0 }
 0x3b6   : > { %668 = vst.msk [vmem:[%s296_s23] sm:$0xff] %vm313_vm1, %v665_v7 }
 0x3b7   : > { %929 = shalt.err (!%p926_p3)
}
 0x3b8   : > { %s930_s18 = scalar_lea.hbm %s1187_s10, 128  ;;  %s934_s22 = scalar_lea.hbm %s1238_s8, 256 }
 0x3b9   : > { %p931_p4 = scmp.ne.s32.totalorder %s1187_s10, %s930_s18  ;;  %p935_p9 = scmp.lt.u32.totalorder %s1187_s10, %s1238_s8 }
 0x3ba   : > { %p936_p10 = scmp.lt.u32.totalorder %s934_s22, %s930_s18  ;;  %p938_p12 = scmp.lt.u32.totalorder %s930_s18, %s1187_s10 }
 0x3bb   : > { %p932_p7 = pnand %p931_p4, %p1068_p5 }
 0x3bc   : > { %p937_p11 = por %p936_p10, %p935_p9 }
 0x3bd   : > { %p933_p8 = pneg %p932_p7 }
 0x3be   : > { %p939_p13 = por %p938_p12, %p937_p11 }
 0x3c0   : > { %p940_p0 = pnand %p939_p13, %p933_p8 }
 0x3c2   : > { %943 = shalt.err (!%p940_p0)
}
 0x3c3   : > { %869 = dma.vmem_to_hbm [thread:$0]  (%p1068_p5), %s1189_s24, 128, %s1187_s10, %s670_s12  }
 0x3c4 PF: > { %p875_p1 = scmp.ge.s32.totalorder %s978_s30, 2  ;;  %s695_s26 = sand.u32 1, %s966_s27  }
 0x3c5   : > { %s696_s13 = scalar_lea.sflag [#allocation4], %s695_s26 }
 0x3c6   : > { %p872_p2 = pnand %p875_p1, %p1072_p6 }
 0x3c8   : > { %961 = dma.done.wait (!%p872_p2), %s696_s13, 128  }
 0x3c9   : > { %963 = vsyncadd (!%p872_p2), %s696_s13, 4294967168  ;;  %p18_p3 = scmp.ge.s32.totalorder %s1055_s11, 4   ;;  %s1241_s27 = smov %s970_s28 }
 0x3ca   : > { %s1242_s28 = smov %s974_s29  ;;  %s1243_s29 = smov %s1066_s14 }
 0x3cb   : > { %s1244_s30 = smov %s1055_s11  ;;  %20 = sbr.rel (!%p18_p3) target bundleno = 3 (0x3), region = 88 }
 0x3d2   :  { %701 = vsyncpa [#allocation4], 1 }
 0x3d3   :  { %703 = vsyncpa [#allocation4 + $0x1], 1 }

</bundles_post_ra>
